<compile_context>
chip_gen: v7x
topology: tpu7x:2x2x1
jax: 0.10.0
libtpu: 0.0.40
codegen_flags: <defaults>
</compile_context>

<pallas_src>
import jax
import jax.numpy as jnp
from jax.experimental import pallas as pl
from jax.experimental.pallas import tpu as pltpu

BN_EPS = 1e-5


# --------------------------------------------------------------------------- #
# offline parameter packing (one bf16 weight slab + one f32 bias/affine slab)
# --------------------------------------------------------------------------- #
def _build_slabs(params, use_top: bool):
    H = params["bu_w2"].shape[0]
    L = params["infmu_w"].shape[1]
    f32 = jnp.float32

    inf_head_w = jnp.concatenate([params["infmu_w"], params["inflv_w"]], axis=1)
    inf_head_b = jnp.concatenate([params["infmu_b"], params["inflv_b"]], axis=1)

    # BN-cancelled Linear biases (bu_b1, bu_b2, td_b1, td_b2) are intentionally dropped.
    weights = [("bu_w1", params["bu_w1"]), ("bu_w2", params["bu_w2"])]
    biases = [("bu_g1", params["bu_g1"]), ("bu_be1", params["bu_be1"]),
              ("bu_g2", params["bu_g2"]), ("bu_be2", params["bu_be2"])]

    if use_top:
        pr_head_w = jnp.concatenate([params["prmu_w"], params["prlv_w"]], axis=1)
        pr_head_b = jnp.concatenate([params["prmu_b"], params["prlv_b"]], axis=1)
        zH = jnp.zeros((H, H), f32)
        zHL = jnp.zeros((H, 2 * L), f32)
        # layer 1: input cat(bu, top) [B,2H] -> [inf1 | pr1] [B,2H]
        tw1 = jnp.concatenate(
            [params["inf_w1"],                                   # [2H, H]
             jnp.concatenate([zH, params["pr_w1"]], axis=0)],    # [2H, H]
            axis=1)                                              # [2H, 2H]
        tb1 = jnp.concatenate([params["inf_b1"], params["pr_b1"]], axis=1)
        # layer 2: block-diagonal [2H, 2H]
        tw2 = jnp.block([[params["inf_w2"], zH], [zH, params["pr_w2"]]])
        tb2 = jnp.concatenate([params["inf_b2"], params["pr_b2"]], axis=1)
        # heads: [2H, 4L] -> [zmu | zlv | pmu | plv]
        thw = jnp.block([[inf_head_w, zHL], [zHL, pr_head_w]])
        thb = jnp.concatenate([inf_head_b, pr_head_b], axis=1)
        weights += [("tw1", tw1), ("tw2", tw2), ("thw", thw)]
        biases += [("tb1", tb1), ("tb2", tb2), ("thb", thb)]
    else:
        weights += [("inf_w1", params["inf_w1"]), ("inf_w2", params["inf_w2"]),
                    ("inf_hw", inf_head_w)]
        biases += [("inf_b1", params["inf_b1"]), ("inf_b2", params["inf_b2"]),
                   ("inf_hb", inf_head_b)]

    weights += [("td_w1", params["td_w1"]), ("td_w2", params["td_w2"])]
    biases += [("td_g1", params["td_g1"]), ("td_be1", params["td_be1"]),
               ("td_g2", params["td_g2"]), ("td_be2", params["td_be2"])]

    # bf16 weight slab: rows padded to a common multiple of 16 (bf16 sublane tile),
    # each weight's columns padded to a 128 boundary so in-kernel slices stay
    # lane-tile aligned.  One HBM->VMEM DMA for every matmul weight in the block.
    max_rows = max(w.shape[0] for _, w in weights)
    rows_pad = -(-max_rows // 16) * 16
    w_slices, blocks, col = {}, [], 0
    for name, w in weights:
        r, c = w.shape
        c_pad = -(-c // 128) * 128
        blk = jnp.zeros((rows_pad, c_pad), f32).at[:r, :c].set(w.astype(f32))
        blocks.append(blk)
        w_slices[name] = (r, col, c)
        col += c_pad
    w_slab = jnp.concatenate(blocks, axis=1).astype(jnp.bfloat16)

    # f32 bias / BN-affine slab: single (1, total) row, sliced by static offsets.
    b_slices, parts, off = {}, [], 0
    for name, b in biases:
        n = b.shape[-1]
        parts.append(b.reshape(1, n).astype(f32))
        b_slices[name] = (off, n)
        off += n
    b_slab = jnp.concatenate(parts, axis=1)

    return w_slab, w_slices, b_slab, b_slices


def _output_layout(use_top: bool, H: int, L: int):
    parts = [("z", L), ("zmu", L), ("zlv", L)]
    if use_top:
        parts += [("pmu", L), ("plv", L)]
    parts += [("bu", H), ("td", H)]
    slices, off = {}, 0
    for name, n in parts:
        slices[name] = (off, n)
        off += n
    out_cols = -(-off // 128) * 128       # lane-dense slab width
    return slices, off, out_cols


# --------------------------------------------------------------------------- #
# kernel
# --------------------------------------------------------------------------- #
def _make_kernel(use_top: bool, L: int, w_slices, b_slices, out_slices):

    def kernel(*refs):
        if use_top:
            x_ref, top_ref, eps_ref, w_ref, b_ref, out_ref = refs
        else:
            x_ref, eps_ref, w_ref, b_ref, out_ref = refs

        bf16 = jnp.bfloat16

        def W(name):                      # static slice view of the bf16 weight slab
            r, c0, c = w_slices[name]
            return w_ref[0:r, c0:c0 + c]

        def Bv(name):                     # static slice of the f32 bias/affine slab
            c0, c = b_slices[name]
            return b_ref[0:1, c0:c0 + c]

        def mm(a16, wname):               # bf16 operands -> MXU, f32 accumulate
            return jnp.dot(a16, W(wname), preferred_element_type=jnp.float32)

        def bn_relu(h, gname, bname):
            # BatchNorm1d training mode: batch mean, biased two-pass variance.
            mean = jnp.mean(h, axis=0, keepdims=True)
            var = jnp.mean(jnp.square(h - mean), axis=0, keepdims=True)
            hn = (h - mean) * jax.lax.rsqrt(var + BN_EPS)
            return jnp.maximum(hn * Bv(gname) + Bv(bname), 0.0)

        x16 = x_ref[...].astype(bf16)
        eps = eps_ref[...]

        # ---- bottom-up tower (Linear -> BN -> ReLU) x2; pre-BN biases cancelled ----
        h = bn_relu(mm(x16, "bu_w1"), "bu_g1", "bu_be1")
        bu = bn_relu(mm(h.astype(bf16), "bu_w2"), "bu_g2", "bu_be2")
        bu16 = bu.astype(bf16)

        if use_top:
            top = top_ref[...]
            top16 = top.astype(bf16)
        else:
            top = bu
            top16 = bu16                  # cat([bu, bu]) when top_down is None

        cat_bt = jnp.concatenate([bu16, top16], axis=-1)

        # ---- inference (+ prior) towers ----
        if use_top:
            # block-diagonal fused inference|prior: 3 matmuls for both towers
            t1 = jnp.maximum(mm(cat_bt, "tw1") + Bv("tb1"), 0.0)
            t2 = jnp.maximum(mm(t1.astype(bf16), "tw2") + Bv("tb2"), 0.0)
            heads = mm(t2.astype(bf16), "thw") + Bv("thb")
            zmu, zlv = heads[:, 0:L], heads[:, L:2 * L]
            pmu, plv = heads[:, 2 * L:3 * L], heads[:, 3 * L:4 * L]
        else:
            i1 = jnp.maximum(mm(cat_bt, "inf_w1") + Bv("inf_b1"), 0.0)
            i2 = jnp.maximum(mm(i1.astype(bf16), "inf_w2") + Bv("inf_b2"), 0.0)
            heads = mm(i2.astype(bf16), "inf_hw") + Bv("inf_hb")
            zmu, zlv = heads[:, 0:L], heads[:, L:2 * L]

        # ---- reparameterization (f32, EUP exp) ----
        z = zmu + eps * jnp.exp(0.5 * zlv)
        z16 = z.astype(bf16)

        # ---- top-down tower; pre-BN biases cancelled ----
        td_in = jnp.concatenate([top16, z16], axis=-1)
        t = bn_relu(mm(td_in, "td_w1"), "td_g1", "td_be1")
        td = bn_relu(mm(t.astype(bf16), "td_w2"), "td_g2", "td_be2")

        # ---- lane-dense packed output: zero once, static-slice stores ----
        out_ref[...] = jnp.zeros_like(out_ref)

        def put(name, val):
            c0, c = out_slices[name]
            out_ref[:, c0:c0 + c] = val.astype(jnp.float32)

        put("z", z)
        put("zmu", zmu)
        put("zlv", zlv)
        if use_top:
            put("pmu", pmu)
            put("plv", plv)
        put("bu", bu)
        put("td", td)

    return kernel


# --------------------------------------------------------------------------- #
# wrapper
# --------------------------------------------------------------------------- #
def ladder_block_forward(params, bottom_up, top_down, eps):
    """Pallas-backed LadderBlock.forward. Returns the same dict as the torch module."""
    B = bottom_up.shape[0]
    in_dim, H = params["bu_w1"].shape
    L = params["infmu_w"].shape[1]
    use_top = top_down is not None

    w_slab, w_slices, b_slab, b_slices = _build_slabs(params, use_top)
    out_slices, n_logical, out_cols = _output_layout(use_top, H, L)

    acts = [bottom_up, top_down, eps] if use_top else [bottom_up, eps]
    args = acts + [w_slab, b_slab]

    vmem = pl.BlockSpec(memory_space=pltpu.MemorySpace.VMEM)

    # Cost estimate so XLA can schedule neighbouring LadderBlocks around this
    # latency-bound call.
    if use_top:
        mm_kn = [(in_dim, H), (H, H), (2 * H, 2 * H), (2 * H, 2 * H),
                 (2 * H, 4 * L), (H + L, H), (H, H)]
    else:
        mm_kn = [(in_dim, H), (H, H), (2 * H, H), (H, H), (H, 2 * L),
                 (H + L, H), (H, H)]
    flops = 2 * B * sum(k * n for k, n in mm_kn)
    transcendentals = 4 * H + B * L           # 4 BN rsqrt rows + reparam exp
    bytes_accessed = (sum(int(a.size) * a.dtype.itemsize for a in args)
                      + B * out_cols * 4)

    slab = pl.pallas_call(
        _make_kernel(use_top, L, w_slices, b_slices, out_slices),
        out_shape=jax.ShapeDtypeStruct((B, out_cols), jnp.float32),
        in_specs=[vmem] * len(args),
        out_specs=vmem,
        compiler_params=pltpu.CompilerParams(vmem_limit_bytes=32 * 1024 * 1024),
        cost_estimate=pl.CostEstimate(flops=flops,
                                      transcendentals=transcendentals,
                                      bytes_accessed=bytes_accessed),
    )(*args)

    def take(name):
        c0, c = out_slices[name]
        return slab[:, c0:c0 + c]

    z, zmu, zlv = take("z"), take("zmu"), take("zlv")
    if use_top:
        pmu, plv = take("pmu"), take("plv")
    else:
        # Zeros never touch the TPU kernel (no pointless writebacks).
        pmu = jnp.zeros((B, L), jnp.float32)
        plv = jnp.zeros((B, L), jnp.float32)
    bu, td = take("bu"), take("td")

    return {"z_sample": z, "z_mu": zmu, "z_logvar": zlv,
            "prior_mu": pmu, "prior_logvar": plv,
            "bu_features": bu, "td_features": td}


# --------------------------------------------------------------------------- #
# references
# --------------------------------------------------------------------------- #
def _bn_relu_ref(h, g, b):
    mean = jnp.mean(h, axis=0, keepdims=True)
    var = jnp.mean(jnp.square(h - mean), axis=0, keepdims=True)
    return jnp.maximum((h - mean) * jax.lax.rsqrt(var + BN_EPS) * g + b, 0.0)


def ladder_block_ref_matched(params, x, top_down, eps):
    """Pure-JAX mirror of the kernel math (bf16 matmuls, dropped pre-BN biases)."""
    use_top = top_down is not None
    p = params
    L = eps.shape[1]
    bf16 = jnp.bfloat16

    def mm(a, w):
        return jnp.dot(a.astype(bf16), w.astype(bf16),
                       preferred_element_type=jnp.float32)

    h = _bn_relu_ref(mm(x, p["bu_w1"]), p["bu_g1"], p["bu_be1"])
    bu = _bn_relu_ref(mm(h, p["bu_w2"]), p["bu_g2"], p["bu_be2"])
    top = top_down if use_top else bu

    i = jnp.maximum(mm(jnp.concatenate([bu, top], axis=-1), p["inf_w1"]) + p["inf_b1"], 0.0)
    i = jnp.maximum(mm(i, p["inf_w2"]) + p["inf_b2"], 0.0)
    zmu = mm(i, p["infmu_w"]) + p["infmu_b"]
    zlv = mm(i, p["inflv_w"]) + p["inflv_b"]
    z = zmu + eps * jnp.exp(0.5 * zlv)

    if use_top:
        pr = jnp.maximum(mm(top, p["pr_w1"]) + p["pr_b1"], 0.0)
        pr = jnp.maximum(mm(pr, p["pr_w2"]) + p["pr_b2"], 0.0)
        pmu = mm(pr, p["prmu_w"]) + p["prmu_b"]
        plv = mm(pr, p["prlv_w"]) + p["prlv_b"]
    else:
        pmu = jnp.zeros_like(zmu)
        plv = jnp.zeros_like(zlv)

    t = _bn_relu_ref(mm(jnp.concatenate([top, z], axis=-1), p["td_w1"]),
                     p["td_g1"], p["td_be1"])
    td = _bn_relu_ref(mm(t, p["td_w2"]), p["td_g2"], p["td_be2"])
    return {"z_sample": z, "z_mu": zmu, "z_logvar": zlv, "prior_mu": pmu,
            "prior_logvar": plv, "bu_features": bu, "td_features": td}


def ladder_block_ref_f32(params, x, top_down, eps):
    """Full-f32 reference matching the original torch module semantics."""
    p = params

    h = _bn_relu_ref(x @ p["bu_w1"] + p["bu_b1"], p["bu_g1"], p["bu_be1"])
    bu = _bn_relu_ref(h @ p["bu_w2"] + p["bu_b2"], p["bu_g2"], p["bu_be2"])

    if top_down is None:
        prior_mu = jnp.zeros((x.shape[0], eps.shape[1]), jnp.float32)
        prior_lv = jnp.zeros_like(prior_mu)
        cat_in = jnp.concatenate([bu, bu], axis=1)
        td_a = bu
    else:
        pr = jnp.maximum(top_down @ p["pr_w1"] + p["pr_b1"], 0.0)
        pr = jnp.maximum(pr @ p["pr_w2"] + p["pr_b2"], 0.0)
        prior_mu = pr @ p["prmu_w"] + p["prmu_b"]
        prior_lv = pr @ p["prlv_w"] + p["prlv_b"]
        cat_in = jnp.concatenate([bu, top_down], axis=1)
        td_a = top_down

    i = jnp.maximum(cat_in @ p["inf_w1"] + p["inf_b1"], 0.0)
    i = jnp.maximum(i @ p["inf_w2"] + p["inf_b2"], 0.0)
    zmu = i @ p["infmu_w"] + p["infmu_b"]
    zlv = i @ p["inflv_w"] + p["inflv_b"]
    z = zmu + eps * jnp.exp(0.5 * zlv)

    t = _bn_relu_ref(jnp.concatenate([td_a, z], axis=1) @ p["td_w1"] + p["td_b1"],
                     p["td_g1"], p["td_be1"])
    td = _bn_relu_ref(t @ p["td_w2"] + p["td_b2"], p["td_g2"], p["td_be2"])

    return {"z_sample": z, "z_mu": zmu, "z_logvar": zlv, "prior_mu": prior_mu,
            "prior_logvar": prior_lv, "bu_features": bu, "td_features": td}


# --------------------------------------------------------------------------- #
# deterministic parameter init
# --------------------------------------------------------------------------- #
def init_params(key, in_dim, latent, hidden):
    def lin(k, fi, fo):
        k1, k2 = jax.random.split(k)
        bound = 1.0 / (fi ** 0.5)
        w = jax.random.uniform(k1, (fi, fo), jnp.float32, -bound, bound)
        b = jax.random.uniform(k2, (1, fo), jnp.float32, -bound, bound)
        return w, b

    def bn(k, d):
        k1, k2 = jax.random.split(k)
        g = 1.0 + 0.1 * jax.random.normal(k1, (1, d), jnp.float32)
        be = 0.1 * jax.random.normal(k2, (1, d), jnp.float32)
        return g, be

    ks = jax.random.split(key, 16)
    p = {}
    p["bu_w1"], p["bu_b1"] = lin(ks[0], in_dim, hidden)
    p["bu_g1"], p["bu_be1"] = bn(ks[1], hidden)
    p["bu_w2"], p["bu_b2"] = lin(ks[2], hidden, hidden)
    p["bu_g2"], p["bu_be2"] = bn(ks[3], hidden)
    p["td_w1"], p["td_b1"] = lin(ks[4], hidden + latent, hidden)
    p["td_g1"], p["td_be1"] = bn(ks[5], hidden)
    p["td_w2"], p["td_b2"] = lin(ks[6], hidden, hidden)
    p["td_g2"], p["td_be2"] = bn(ks[7], hidden)
    p["inf_w1"], p["inf_b1"] = lin(ks[8], hidden * 2, hidden)
    p["inf_w2"], p["inf_b2"] = lin(ks[9], hidden, hidden)
    p["infmu_w"], p["infmu_b"] = lin(ks[10], hidden, latent)
    p["inflv_w"], p["inflv_b"] = lin(ks[11], hidden, latent)
    p["pr_w1"], p["pr_b1"] = lin(ks[12], hidden, hidden)
    p["pr_w2"], p["pr_b2"] = lin(ks[13], hidden, hidden)
    p["prmu_w"], p["prmu_b"] = lin(ks[14], hidden, latent)
    p["prlv_w"], p["prlv_b"] = lin(ks[15], hidden, latent)
    return p


if __name__ == "__main__":
    B, IN_DIM, LATENT, HIDDEN = 8, 16, 8, 32
    key = jax.random.PRNGKey(0)
    k_params, k_x, k_top, k_eps = jax.random.split(key, 4)

    params = init_params(k_params, IN_DIM, LATENT, HIDDEN)
    x = jax.random.normal(k_x, (B, IN_DIM), jnp.float32)
    top = jax.random.normal(k_top, (B, HIDDEN), jnp.float32)
    # Reparameterization noise sampled host-side (deterministic under PRNGKey(0)).
    eps = jax.random.normal(k_eps, (B, LATENT), jnp.float32)

    for top_down in (top, None):   # case 1: top_down provided; case 2: top-level block
        out = ladder_block_forward(params, x, top_down, eps)
        jax.block_until_ready(out)
        ref_m = ladder_block_ref_matched(params, x, top_down, eps)
        ref_f = ladder_block_ref_f32(params, x, top_down, eps)
        for k in out:
            # Tight check vs the bf16-matmul mirror of the kernel math.
            assert jnp.allclose(out[k], ref_m[k], atol=1e-2, rtol=1e-2), \
                f"matched-ref mismatch: {k}"
            # Loose check vs the full-f32 torch-equivalent spec (bf16 MXU precision).
            assert jnp.allclose(out[k], ref_f[k], atol=2e-1, rtol=2e-1), \
                f"f32-ref mismatch: {k}"

    print("KERNEL_OK")
</pallas_src>

<mosaic_0001>
module attributes {stable_mosaic.version = 11 : i64} {
  func.func @kernel(%arg0: memref<8x16xf32, #tpu.memory_space<vmem>>, %arg1: memref<8x32xf32, #tpu.memory_space<vmem>>, %arg2: memref<8x8xf32, #tpu.memory_space<vmem>>, %arg3: memref<64x896xbf16, #tpu.memory_space<vmem>>, %arg4: memref<1x416xf32, #tpu.memory_space<vmem>>, %arg5: memref<8x128xf32, #tpu.memory_space<vmem>>) attributes {dimension_semantics = [], scalar_prefetch = 0 : i64, scratch_operands = 0 : i64, tpu.core_type = #tpu.core_type<tc>} {
    %c0 = arith.constant 0 : index
    %c0_0 = arith.constant 0 : index
    %0 = vector.load %arg0[%c0, %c0_0] : memref<8x16xf32, #tpu.memory_space<vmem>>, vector<8x16xf32>
    %1 = arith.truncf %0 : vector<8x16xf32> to vector<8x16xbf16>
    %c0_1 = arith.constant 0 : index
    %c0_2 = arith.constant 0 : index
    %2 = vector.load %arg2[%c0_1, %c0_2] : memref<8x8xf32, #tpu.memory_space<vmem>>, vector<8x8xf32>
    %c0_3 = arith.constant 0 : index
    %c0_4 = arith.constant 0 : index
    %3 = vector.load %arg3[%c0_3, %c0_4] : memref<64x896xbf16, #tpu.memory_space<vmem>>, vector<16x32xbf16>
    %cst = arith.constant dense<0.000000e+00> : vector<8x32xf32>
    %4 = tpu.matmul %1, %3, %cst {dimension_numbers = #tpu.dot_dimension_numbers<[1], [0], [0], [1], [0, 0, 1, 1], [], []>} : vector<8x16xbf16>, vector<16x32xbf16>, vector<8x32xf32> -> vector<8x32xf32>
    %cst_5 = arith.constant dense<0.000000e+00> : vector<32xf32>
    %5 = vector.multi_reduction <add>, %4, %cst_5 [0] : vector<8x32xf32> to vector<32xf32>
    %6 = vector.shape_cast %5 : vector<32xf32> to vector<1x32xf32>
    %cst_6 = arith.constant 8.000000e+00 : f32
    %7 = vector.broadcast %cst_6 : f32 to vector<1x32xf32>
    %8 = arith.divf %6, %7 : vector<1x32xf32>
    %9 = vector.broadcast %8 : vector<1x32xf32> to vector<8x32xf32>
    %10 = arith.subf %4, %9 : vector<8x32xf32>
    %11 = arith.mulf %10, %10 : vector<8x32xf32>
    %cst_7 = arith.constant dense<0.000000e+00> : vector<32xf32>
    %12 = vector.multi_reduction <add>, %11, %cst_7 [0] : vector<8x32xf32> to vector<32xf32>
    %13 = vector.shape_cast %12 : vector<32xf32> to vector<1x32xf32>
    %cst_8 = arith.constant 8.000000e+00 : f32
    %14 = vector.broadcast %cst_8 : f32 to vector<1x32xf32>
    %15 = arith.divf %13, %14 : vector<1x32xf32>
    %16 = vector.broadcast %8 : vector<1x32xf32> to vector<8x32xf32>
    %17 = arith.subf %4, %16 : vector<8x32xf32>
    %cst_9 = arith.constant 9.99999974E-6 : f32
    %18 = vector.broadcast %cst_9 : f32 to vector<1x32xf32>
    %19 = arith.addf %15, %18 : vector<1x32xf32>
    %20 = math.rsqrt %19 : vector<1x32xf32>
    %21 = vector.broadcast %20 : vector<1x32xf32> to vector<8x32xf32>
    %22 = arith.mulf %17, %21 : vector<8x32xf32>
    %c0_10 = arith.constant 0 : index
    %c0_11 = arith.constant 0 : index
    %23 = vector.load %arg4[%c0_10, %c0_11] : memref<1x416xf32, #tpu.memory_space<vmem>>, vector<1x32xf32>
    %24 = vector.broadcast %23 : vector<1x32xf32> to vector<8x32xf32>
    %25 = arith.mulf %22, %24 : vector<8x32xf32>
    %c0_12 = arith.constant 0 : index
    %c32 = arith.constant 32 : index
    %26 = vector.load %arg4[%c0_12, %c32] : memref<1x416xf32, #tpu.memory_space<vmem>>, vector<1x32xf32>
    %27 = vector.broadcast %26 : vector<1x32xf32> to vector<8x32xf32>
    %28 = arith.addf %25, %27 : vector<8x32xf32>
    %cst_13 = arith.constant 0.000000e+00 : f32
    %29 = vector.broadcast %cst_13 : f32 to vector<8x32xf32>
    %30 = arith.maximumf %28, %29 : vector<8x32xf32>
    %31 = arith.truncf %30 : vector<8x32xf32> to vector<8x32xbf16>
    %c0_14 = arith.constant 0 : index
    %c128 = arith.constant 128 : index
    %32 = vector.load %arg3[%c0_14, %c128] : memref<64x896xbf16, #tpu.memory_space<vmem>>, vector<32x32xbf16>
    %cst_15 = arith.constant dense<0.000000e+00> : vector<8x32xf32>
    %33 = tpu.matmul %31, %32, %cst_15 {dimension_numbers = #tpu.dot_dimension_numbers<[1], [0], [0], [1], [0, 0, 1, 1], [], []>} : vector<8x32xbf16>, vector<32x32xbf16>, vector<8x32xf32> -> vector<8x32xf32>
    %cst_16 = arith.constant dense<0.000000e+00> : vector<32xf32>
    %34 = vector.multi_reduction <add>, %33, %cst_16 [0] : vector<8x32xf32> to vector<32xf32>
    %35 = vector.shape_cast %34 : vector<32xf32> to vector<1x32xf32>
    %cst_17 = arith.constant 8.000000e+00 : f32
    %36 = vector.broadcast %cst_17 : f32 to vector<1x32xf32>
    %37 = arith.divf %35, %36 : vector<1x32xf32>
    %38 = vector.broadcast %37 : vector<1x32xf32> to vector<8x32xf32>
    %39 = arith.subf %33, %38 : vector<8x32xf32>
    %40 = arith.mulf %39, %39 : vector<8x32xf32>
    %cst_18 = arith.constant dense<0.000000e+00> : vector<32xf32>
    %41 = vector.multi_reduction <add>, %40, %cst_18 [0] : vector<8x32xf32> to vector<32xf32>
    %42 = vector.shape_cast %41 : vector<32xf32> to vector<1x32xf32>
    %cst_19 = arith.constant 8.000000e+00 : f32
    %43 = vector.broadcast %cst_19 : f32 to vector<1x32xf32>
    %44 = arith.divf %42, %43 : vector<1x32xf32>
    %45 = vector.broadcast %37 : vector<1x32xf32> to vector<8x32xf32>
    %46 = arith.subf %33, %45 : vector<8x32xf32>
    %cst_20 = arith.constant 9.99999974E-6 : f32
    %47 = vector.broadcast %cst_20 : f32 to vector<1x32xf32>
    %48 = arith.addf %44, %47 : vector<1x32xf32>
    %49 = math.rsqrt %48 : vector<1x32xf32>
    %50 = vector.broadcast %49 : vector<1x32xf32> to vector<8x32xf32>
    %51 = arith.mulf %46, %50 : vector<8x32xf32>
    %c0_21 = arith.constant 0 : index
    %c64 = arith.constant 64 : index
    %52 = vector.load %arg4[%c0_21, %c64] : memref<1x416xf32, #tpu.memory_space<vmem>>, vector<1x32xf32>
    %53 = vector.broadcast %52 : vector<1x32xf32> to vector<8x32xf32>
    %54 = arith.mulf %51, %53 : vector<8x32xf32>
    %c0_22 = arith.constant 0 : index
    %c96 = arith.constant 96 : index
    %55 = vector.load %arg4[%c0_22, %c96] : memref<1x416xf32, #tpu.memory_space<vmem>>, vector<1x32xf32>
    %56 = vector.broadcast %55 : vector<1x32xf32> to vector<8x32xf32>
    %57 = arith.addf %54, %56 : vector<8x32xf32>
    %cst_23 = arith.constant 0.000000e+00 : f32
    %58 = vector.broadcast %cst_23 : f32 to vector<8x32xf32>
    %59 = arith.maximumf %57, %58 : vector<8x32xf32>
    %60 = arith.truncf %59 : vector<8x32xf32> to vector<8x32xbf16>
    %c0_24 = arith.constant 0 : index
    %c0_25 = arith.constant 0 : index
    %61 = vector.load %arg1[%c0_24, %c0_25] : memref<8x32xf32, #tpu.memory_space<vmem>>, vector<8x32xf32>
    %62 = arith.truncf %61 : vector<8x32xf32> to vector<8x32xbf16>
    %63 = tpu.concatenate %60, %62 in 1 : vector<8x32xbf16>, vector<8x32xbf16> -> vector<8x64xbf16>
    %c0_26 = arith.constant 0 : index
    %c256 = arith.constant 256 : index
    %64 = vector.load %arg3[%c0_26, %c256] : memref<64x896xbf16, #tpu.memory_space<vmem>>, vector<64x64xbf16>
    %cst_27 = arith.constant dense<0.000000e+00> : vector<8x64xf32>
    %65 = tpu.matmul %63, %64, %cst_27 {dimension_numbers = #tpu.dot_dimension_numbers<[1], [0], [0], [1], [0, 0, 1, 1], [], []>} : vector<8x64xbf16>, vector<64x64xbf16>, vector<8x64xf32> -> vector<8x64xf32>
    %c0_28 = arith.constant 0 : index
    %c128_29 = arith.constant 128 : index
    %66 = vector.load %arg4[%c0_28, %c128_29] : memref<1x416xf32, #tpu.memory_space<vmem>>, vector<1x64xf32>
    %67 = vector.broadcast %66 : vector<1x64xf32> to vector<8x64xf32>
    %68 = arith.addf %65, %67 : vector<8x64xf32>
    %cst_30 = arith.constant 0.000000e+00 : f32
    %69 = vector.broadcast %cst_30 : f32 to vector<8x64xf32>
    %70 = arith.maximumf %68, %69 : vector<8x64xf32>
    %71 = arith.truncf %70 : vector<8x64xf32> to vector<8x64xbf16>
    %c0_31 = arith.constant 0 : index
    %c384 = arith.constant 384 : index
    %72 = vector.load %arg3[%c0_31, %c384] : memref<64x896xbf16, #tpu.memory_space<vmem>>, vector<64x64xbf16>
    %cst_32 = arith.constant dense<0.000000e+00> : vector<8x64xf32>
    %73 = tpu.matmul %71, %72, %cst_32 {dimension_numbers = #tpu.dot_dimension_numbers<[1], [0], [0], [1], [0, 0, 1, 1], [], []>} : vector<8x64xbf16>, vector<64x64xbf16>, vector<8x64xf32> -> vector<8x64xf32>
    %c0_33 = arith.constant 0 : index
    %c192 = arith.constant 192 : index
    %74 = vector.load %arg4[%c0_33, %c192] : memref<1x416xf32, #tpu.memory_space<vmem>>, vector<1x64xf32>
    %75 = vector.broadcast %74 : vector<1x64xf32> to vector<8x64xf32>
    %76 = arith.addf %73, %75 : vector<8x64xf32>
    %cst_34 = arith.constant 0.000000e+00 : f32
    %77 = vector.broadcast %cst_34 : f32 to vector<8x64xf32>
    %78 = arith.maximumf %76, %77 : vector<8x64xf32>
    %79 = arith.truncf %78 : vector<8x64xf32> to vector<8x64xbf16>
    %c0_35 = arith.constant 0 : index
    %c512 = arith.constant 512 : index
    %80 = vector.load %arg3[%c0_35, %c512] : memref<64x896xbf16, #tpu.memory_space<vmem>>, vector<64x32xbf16>
    %cst_36 = arith.constant dense<0.000000e+00> : vector<8x32xf32>
    %81 = tpu.matmul %79, %80, %cst_36 {dimension_numbers = #tpu.dot_dimension_numbers<[1], [0], [0], [1], [0, 0, 1, 1], [], []>} : vector<8x64xbf16>, vector<64x32xbf16>, vector<8x32xf32> -> vector<8x32xf32>
    %c0_37 = arith.constant 0 : index
    %c256_38 = arith.constant 256 : index
    %82 = vector.load %arg4[%c0_37, %c256_38] : memref<1x416xf32, #tpu.memory_space<vmem>>, vector<1x32xf32>
    %83 = vector.broadcast %82 : vector<1x32xf32> to vector<8x32xf32>
    %84 = arith.addf %81, %83 : vector<8x32xf32>
    %85 = vector.extract_strided_slice %84 {offsets = [0, 0], sizes = [8, 8], strides = [1, 1]} : vector<8x32xf32> to vector<8x8xf32>
    %86 = vector.extract_strided_slice %84 {offsets = [0, 8], sizes = [8, 8], strides = [1, 1]} : vector<8x32xf32> to vector<8x8xf32>
    %87 = vector.extract_strided_slice %84 {offsets = [0, 16], sizes = [8, 8], strides = [1, 1]} : vector<8x32xf32> to vector<8x8xf32>
    %88 = vector.extract_strided_slice %84 {offsets = [0, 24], sizes = [8, 8], strides = [1, 1]} : vector<8x32xf32> to vector<8x8xf32>
    %cst_39 = arith.constant 5.000000e-01 : f32
    %89 = vector.broadcast %cst_39 : f32 to vector<8x8xf32>
    %90 = arith.mulf %89, %86 : vector<8x8xf32>
    %91 = math.exp %90 : vector<8x8xf32>
    %92 = arith.mulf %2, %91 : vector<8x8xf32>
    %93 = arith.addf %85, %92 : vector<8x8xf32>
    %94 = arith.truncf %93 : vector<8x8xf32> to vector<8x8xbf16>
    %95 = tpu.concatenate %62, %94 in 1 : vector<8x32xbf16>, vector<8x8xbf16> -> vector<8x40xbf16>
    %c0_40 = arith.constant 0 : index
    %c640 = arith.constant 640 : index
    %96 = vector.load %arg3[%c0_40, %c640] : memref<64x896xbf16, #tpu.memory_space<vmem>>, vector<40x32xbf16>
    %cst_41 = arith.constant dense<0.000000e+00> : vector<8x32xf32>
    %97 = tpu.matmul %95, %96, %cst_41 {dimension_numbers = #tpu.dot_dimension_numbers<[1], [0], [0], [1], [0, 0, 1, 1], [], []>} : vector<8x40xbf16>, vector<40x32xbf16>, vector<8x32xf32> -> vector<8x32xf32>
    %cst_42 = arith.constant dense<0.000000e+00> : vector<32xf32>
    %98 = vector.multi_reduction <add>, %97, %cst_42 [0] : vector<8x32xf32> to vector<32xf32>
    %99 = vector.shape_cast %98 : vector<32xf32> to vector<1x32xf32>
    %cst_43 = arith.constant 8.000000e+00 : f32
    %100 = vector.broadcast %cst_43 : f32 to vector<1x32xf32>
    %101 = arith.divf %99, %100 : vector<1x32xf32>
    %102 = vector.broadcast %101 : vector<1x32xf32> to vector<8x32xf32>
    %103 = arith.subf %97, %102 : vector<8x32xf32>
    %104 = arith.mulf %103, %103 : vector<8x32xf32>
    %cst_44 = arith.constant dense<0.000000e+00> : vector<32xf32>
    %105 = vector.multi_reduction <add>, %104, %cst_44 [0] : vector<8x32xf32> to vector<32xf32>
    %106 = vector.shape_cast %105 : vector<32xf32> to vector<1x32xf32>
    %cst_45 = arith.constant 8.000000e+00 : f32
    %107 = vector.broadcast %cst_45 : f32 to vector<1x32xf32>
    %108 = arith.divf %106, %107 : vector<1x32xf32>
    %109 = vector.broadcast %101 : vector<1x32xf32> to vector<8x32xf32>
    %110 = arith.subf %97, %109 : vector<8x32xf32>
    %cst_46 = arith.constant 9.99999974E-6 : f32
    %111 = vector.broadcast %cst_46 : f32 to vector<1x32xf32>
    %112 = arith.addf %108, %111 : vector<1x32xf32>
    %113 = math.rsqrt %112 : vector<1x32xf32>
    %114 = vector.broadcast %113 : vector<1x32xf32> to vector<8x32xf32>
    %115 = arith.mulf %110, %114 : vector<8x32xf32>
    %c0_47 = arith.constant 0 : index
    %c288 = arith.constant 288 : index
    %116 = vector.load %arg4[%c0_47, %c288] : memref<1x416xf32, #tpu.memory_space<vmem>>, vector<1x32xf32>
    %117 = vector.broadcast %116 : vector<1x32xf32> to vector<8x32xf32>
    %118 = arith.mulf %115, %117 : vector<8x32xf32>
    %c0_48 = arith.constant 0 : index
    %c320 = arith.constant 320 : index
    %119 = vector.load %arg4[%c0_48, %c320] : memref<1x416xf32, #tpu.memory_space<vmem>>, vector<1x32xf32>
    %120 = vector.broadcast %119 : vector<1x32xf32> to vector<8x32xf32>
    %121 = arith.addf %118, %120 : vector<8x32xf32>
    %cst_49 = arith.constant 0.000000e+00 : f32
    %122 = vector.broadcast %cst_49 : f32 to vector<8x32xf32>
    %123 = arith.maximumf %121, %122 : vector<8x32xf32>
    %124 = arith.truncf %123 : vector<8x32xf32> to vector<8x32xbf16>
    %c0_50 = arith.constant 0 : index
    %c768 = arith.constant 768 : index
    %125 = vector.load %arg3[%c0_50, %c768] : memref<64x896xbf16, #tpu.memory_space<vmem>>, vector<32x32xbf16>
    %cst_51 = arith.constant dense<0.000000e+00> : vector<8x32xf32>
    %126 = tpu.matmul %124, %125, %cst_51 {dimension_numbers = #tpu.dot_dimension_numbers<[1], [0], [0], [1], [0, 0, 1, 1], [], []>} : vector<8x32xbf16>, vector<32x32xbf16>, vector<8x32xf32> -> vector<8x32xf32>
    %cst_52 = arith.constant dense<0.000000e+00> : vector<32xf32>
    %127 = vector.multi_reduction <add>, %126, %cst_52 [0] : vector<8x32xf32> to vector<32xf32>
    %128 = vector.shape_cast %127 : vector<32xf32> to vector<1x32xf32>
    %cst_53 = arith.constant 8.000000e+00 : f32
    %129 = vector.broadcast %cst_53 : f32 to vector<1x32xf32>
    %130 = arith.divf %128, %129 : vector<1x32xf32>
    %131 = vector.broadcast %130 : vector<1x32xf32> to vector<8x32xf32>
    %132 = arith.subf %126, %131 : vector<8x32xf32>
    %133 = arith.mulf %132, %132 : vector<8x32xf32>
    %cst_54 = arith.constant dense<0.000000e+00> : vector<32xf32>
    %134 = vector.multi_reduction <add>, %133, %cst_54 [0] : vector<8x32xf32> to vector<32xf32>
    %135 = vector.shape_cast %134 : vector<32xf32> to vector<1x32xf32>
    %cst_55 = arith.constant 8.000000e+00 : f32
    %136 = vector.broadcast %cst_55 : f32 to vector<1x32xf32>
    %137 = arith.divf %135, %136 : vector<1x32xf32>
    %138 = vector.broadcast %130 : vector<1x32xf32> to vector<8x32xf32>
    %139 = arith.subf %126, %138 : vector<8x32xf32>
    %cst_56 = arith.constant 9.99999974E-6 : f32
    %140 = vector.broadcast %cst_56 : f32 to vector<1x32xf32>
    %141 = arith.addf %137, %140 : vector<1x32xf32>
    %142 = math.rsqrt %141 : vector<1x32xf32>
    %143 = vector.broadcast %142 : vector<1x32xf32> to vector<8x32xf32>
    %144 = arith.mulf %139, %143 : vector<8x32xf32>
    %c0_57 = arith.constant 0 : index
    %c352 = arith.constant 352 : index
    %145 = vector.load %arg4[%c0_57, %c352] : memref<1x416xf32, #tpu.memory_space<vmem>>, vector<1x32xf32>
    %146 = vector.broadcast %145 : vector<1x32xf32> to vector<8x32xf32>
    %147 = arith.mulf %144, %146 : vector<8x32xf32>
    %c0_58 = arith.constant 0 : index
    %c384_59 = arith.constant 384 : index
    %148 = vector.load %arg4[%c0_58, %c384_59] : memref<1x416xf32, #tpu.memory_space<vmem>>, vector<1x32xf32>
    %149 = vector.broadcast %148 : vector<1x32xf32> to vector<8x32xf32>
    %150 = arith.addf %147, %149 : vector<8x32xf32>
    %cst_60 = arith.constant 0.000000e+00 : f32
    %151 = vector.broadcast %cst_60 : f32 to vector<8x32xf32>
    %152 = arith.maximumf %150, %151 : vector<8x32xf32>
    %cst_61 = arith.constant 0.000000e+00 : f32
    %153 = vector.broadcast %cst_61 : f32 to vector<8x128xf32>
    %c0_62 = arith.constant 0 : index
    %c0_63 = arith.constant 0 : index
    %154 = vector.load %arg5[%c0_62, %c0_63] : memref<8x128xf32, #tpu.memory_space<vmem>>, vector<8x128xf32>
    tpu.vector_store %arg5[%c0_62, %c0_63], %153 {strides = array<i32>} : memref<8x128xf32, #tpu.memory_space<vmem>>, vector<8x128xf32>,
    %c0_64 = arith.constant 0 : index
    %c0_65 = arith.constant 0 : index
    %155 = vector.load %arg5[%c0_64, %c0_65] : memref<8x128xf32, #tpu.memory_space<vmem>>, vector<8x8xf32>
    tpu.vector_store %arg5[%c0_64, %c0_65], %93 {strides = array<i32>} : memref<8x128xf32, #tpu.memory_space<vmem>>, vector<8x8xf32>,
    %c0_66 = arith.constant 0 : index
    %c8 = arith.constant 8 : index
    %156 = vector.load %arg5[%c0_66, %c8] : memref<8x128xf32, #tpu.memory_space<vmem>>, vector<8x8xf32>
    tpu.vector_store %arg5[%c0_66, %c8], %85 {strides = array<i32>} : memref<8x128xf32, #tpu.memory_space<vmem>>, vector<8x8xf32>,
    %c0_67 = arith.constant 0 : index
    %c16 = arith.constant 16 : index
    %157 = vector.load %arg5[%c0_67, %c16] : memref<8x128xf32, #tpu.memory_space<vmem>>, vector<8x8xf32>
    tpu.vector_store %arg5[%c0_67, %c16], %86 {strides = array<i32>} : memref<8x128xf32, #tpu.memory_space<vmem>>, vector<8x8xf32>,
    %c0_68 = arith.constant 0 : index
    %c24 = arith.constant 24 : index
    %158 = vector.load %arg5[%c0_68, %c24] : memref<8x128xf32, #tpu.memory_space<vmem>>, vector<8x8xf32>
    tpu.vector_store %arg5[%c0_68, %c24], %87 {strides = array<i32>} : memref<8x128xf32, #tpu.memory_space<vmem>>, vector<8x8xf32>,
    %c0_69 = arith.constant 0 : index
    %c32_70 = arith.constant 32 : index
    %159 = vector.load %arg5[%c0_69, %c32_70] : memref<8x128xf32, #tpu.memory_space<vmem>>, vector<8x8xf32>
    tpu.vector_store %arg5[%c0_69, %c32_70], %88 {strides = array<i32>} : memref<8x128xf32, #tpu.memory_space<vmem>>, vector<8x8xf32>,
    %c0_71 = arith.constant 0 : index
    %c40 = arith.constant 40 : index
    %160 = vector.load %arg5[%c0_71, %c40] : memref<8x128xf32, #tpu.memory_space<vmem>>, vector<8x32xf32>
    tpu.vector_store %arg5[%c0_71, %c40], %59 {strides = array<i32>} : memref<8x128xf32, #tpu.memory_space<vmem>>, vector<8x32xf32>,
    %c0_72 = arith.constant 0 : index
    %c72 = arith.constant 72 : index
    %161 = vector.load %arg5[%c0_72, %c72] : memref<8x128xf32, #tpu.memory_space<vmem>>, vector<8x32xf32>
    tpu.vector_store %arg5[%c0_72, %c72], %152 {strides = array<i32>} : memref<8x128xf32, #tpu.memory_space<vmem>>, vector<8x32xf32>,
    return
  }
}

</mosaic_0001>

<bundles_post_ra>
// kernel: tpu_custom_call.1
= control target key start
LH: loop header
LB: loop body
LE: loop exit
PB: predicated region body
PF: predicated region fallthrough
CT: control target
= control target key end

     0   :  { %10 = vsyncpa [#allocation3], 0  ;;  %s1244_s0 = inlined_call_operand.hbm [shape: f32[8,16], index: 0, kind: input, shape index: {}]   ;;  %s1245_s1 = inlined_call_operand.hbm [shape: f32[8,32], index: 1, kind: input, shape index: {}]   ;;  %s1246_s2 = inlined_call_operand.hbm [shape: f32[8,8], index: 2, kind: input, shape index: {}]   ;;  %s1247_s3 = inlined_call_operand.hbm [shape: bf16[64,896], index: 3, kind: input, shape index: {}]   ;;  %s1248_s4 = inlined_call_operand.vmem [shape: f32[1,416], index: 4, kind: input, shape index: {}]   ;;  %s1249_s5 = inlined_call_operand.hbm [shape: f32[8,128], index: 5, kind: output, shape index: {}]  }
   0x1   :  { %11 = vsyncpa [#allocation6], 0 }
   0x2   :  { %12 = vsyncpa [#allocation9], 0 }
   0x3   :  { %13 = vsyncpa [#allocation4], 0  ;;  %s1048_s18 = smov [#allocation5]   ;;  %s1049_s20 = smov [#allocation2]  }
   0x4   :  { %s30_s19 = sshll.u32 %s1048_s18, 4  ;;  %s20_s21 = sshll.u32 %s1049_s20, 4  ;;  %s31_s19 = int_to_ptr.vmem [resolvable:$true] %s30_s19  ;;  %s21_s21 = int_to_ptr.vmem [resolvable:$true] %s20_s21 }
   0x5   :  { %s930_s24 = scalar_lea.hbm %s1245_s1, 128 }
   0x6   :  { %p931_p0 = scmp.ne.s32.totalorder %s1245_s1, %s930_s24  ;;  %p934_p1 = scmp.lt.u32.totalorder %s930_s24, %s1245_s1 }
   0x8   :  { %p936_p2 = pnand %p934_p1, %p931_p0 }
   0xa   :  { %939 = shalt.err (!%p936_p2)
}
   0xb   :  { %s940_s29 = scalar_lea.vmem %s31_s19, 128  ;;  %p945_p4 = scmp.lt.s32.totalorder %s31_s19, %s31_s19 }
   0xc   :  { %p941_p3 = scmp.ne.s32.totalorder %s31_s19, %s940_s29  ;;  %p946_p5 = scmp.lt.s32.totalorder %s940_s29, %s940_s29 }
   0xe   :  { %p947_p6 = por %p946_p5, %p945_p4 }
  0x10   :  { %p948_p7 = pnand %p947_p6, %p941_p3 }
  0x12   :  { %951 = shalt.err (!%p948_p7)
}
  0x13   :  { %33 = dma.hbm_to_vmem [thread:$0]  %s1245_s1, 128, %s31_s19, [#allocation6]  }
  0x14   :  { %s952_s9 = scalar_lea.hbm %s1244_s0, 128 }
  0x15   :  { %p953_p8 = scmp.ne.s32.totalorder %s1244_s0, %s952_s9  ;;  %p956_p9 = scmp.lt.u32.totalorder %s952_s9, %s1244_s0 }
  0x17   :  { %p958_p10 = pnand %p956_p9, %p953_p8 }
  0x19   :  { %961 = shalt.err (!%p958_p10)
}
  0x1a   :  { %s962_s14 = scalar_lea.vmem %s21_s21, 128  ;;  %p967_p12 = scmp.lt.s32.totalorder %s21_s21, %s21_s21 }
  0x1b   :  { %p963_p11 = scmp.ne.s32.totalorder %s21_s21, %s962_s14  ;;  %p968_p13 = scmp.lt.s32.totalorder %s962_s14, %s962_s14 }
  0x1d   :  { %p969_p0 = por %p968_p13, %p967_p12 }
  0x1f   :  { %p970_p1 = pnand %p969_p0, %p963_p11 }
  0x21   :  { %973 = shalt.err (!%p970_p1)
}
  0x22   :  { %23 = dma.hbm_to_vmem [thread:$0]  %s1244_s0, 128, %s21_s21, [#allocation3]  }
  0x23   :  { %s1050_s16 = smov [#allocation7]   ;;  %s1051_s18 = smov [#allocation8]  }
  0x24   :  { %s40_s17 = sshll.u32 %s1050_s16, 4  ;;  %s49_s19 = sshll.u32 %s1051_s18, 4  ;;  %s41_s17 = int_to_ptr.vmem [resolvable:$true] %s40_s17  ;;  %s1118_s19 = int_to_ptr.vmem [resolvable:$true] %s49_s19 }
  0x25   :  { %s974_s23 = scalar_lea.hbm %s1246_s2, 128 }
  0x26   :  { %p975_p2 = scmp.ne.s32.totalorder %s1246_s2, %s974_s23  ;;  %p978_p3 = scmp.lt.u32.totalorder %s974_s23, %s1246_s2 }
  0x28   :  { %p980_p4 = pnand %p978_p3, %p975_p2 }
  0x2a   :  { %983 = shalt.err (!%p980_p4)
}
  0x2b   :  { %s984_s0 = scalar_lea.vmem %s41_s17, 128  ;;  %p989_p6 = scmp.lt.s32.totalorder %s41_s17, %s41_s17 }
  0x2c   :  { %p985_p5 = scmp.ne.s32.totalorder %s41_s17, %s984_s0  ;;  %p990_p7 = scmp.lt.s32.totalorder %s984_s0, %s984_s0 }
  0x2e   :  { %p991_p8 = por %p990_p7, %p989_p6 }
  0x30   :  { %p992_p9 = pnand %p991_p8, %p985_p5 }
  0x32   :  { %995 = shalt.err (!%p992_p9)
}
  0x33   :  { %43 = dma.hbm_to_vmem [thread:$0]  %s1246_s2, 128, %s41_s17, [#allocation6]  }
  0x34   :  { %s996_s6 = scalar_lea.hbm %s1247_s3, 3584 }
  0x35   :  { %p997_p10 = scmp.ne.s32.totalorder %s1247_s3, %s996_s6  ;;  %p1000_p11 = scmp.lt.u32.totalorder %s996_s6, %s1247_s3 }
  0x37   :  { %p1002_p12 = pnand %p1000_p11, %p997_p10 }
  0x39   :  { %1005 = shalt.err (!%p1002_p12)
}
  0x3a   :  { %s1006_s11 = scalar_lea.vmem %s1118_s19, 3584  ;;  %p1011_p0 = scmp.lt.s32.totalorder %s1118_s19, %s1118_s19 }
  0x3b   :  { %p1007_p13 = scmp.ne.s32.totalorder %s1118_s19, %s1006_s11  ;;  %p1012_p1 = scmp.lt.s32.totalorder %s1006_s11, %s1006_s11 }
  0x3d   :  { %p1013_p2 = por %p1012_p1, %p1011_p0 }
  0x3f   :  { %p1014_p3 = pnand %p1013_p2, %p1007_p13 }
  0x41   :  { %1017 = shalt.err (!%p1014_p3)
}
  0x42   :  { %s1052_s2 = smov 448   ;;  %s1053_s12 = smov 28  }
  0x43   :  { %55 = dma.hbm_to_vmem [thread:$0]  %s1247_s3, 3584, %s1118_s19, [#allocation9], %s1052_s2, %s1052_s2, %s1053_s12  }
  0x44   :  { %1040 = dma.done.wait [#allocation3], 128  }
  0x45   :  { %1041 = vsyncadd [#allocation3], 4294967168 }
  0x46   :  { %1042 = dma.done.wait [#allocation6], 256  }
  0x47   :  { %1043 = vsyncadd [#allocation6], 4294967040 }
  0x48   :  { %1044 = dma.done.wait [#allocation9], 3584  }
  0x49   :  { %1045 = vsyncadd [#allocation9], 4294963712  ;;  %v1054_v0 = vmov 0.0   ;;  %vm1055_vm0 = vmmov 0   ;;  %v900_v1 = vld [vmem:[#allocation8] ss:$28 sps:$4 sm:$0xff]  }
  0x4a   :  { %816 = vmatprep.subr.bf16.mxu1 %v1054_v0  ;;  %714 = vst [vmem:[#allocation10] sm:$0xff] %v1054_v0  ;;  %818 = vmatprep.mubr.msk.bf16.mxu1 %vm1055_vm0, %v1054_v0  ;;  %v71_v2 = vld [vmem:[#allocation2] sm:$0xff]  ;;  %vm82_vm1 = vcmask 130048   ;;  %s1056_s15 = smov 96   ;;  %v901_v5 = vld [vmem:[#allocation8 + $0x4] ss:$28 sps:$4 sm:$0xff]  }
  0x4b   :  { %830 = vmatprep.subr.bf16.mxu0 %v1054_v0  ;;  %838 = vmatprep.mubr.msk.bf16.mxu0 %vm1055_vm0, %v1054_v0  ;;  %v760_v3 = vld [vmem:[%s1248_s4] ss:$0 sm:$0xff]  ;;  %v72_v4 = vpack.c.bf16 %v71_v2, %v71_v2  ;;  %v902_v6 = vld [vmem:[#allocation8 + $0x3c] ss:$28 sps:$4 sm:$0xff]   ;;  %v253_v7 = vld [vmem:[#allocation5] sm:$0xff]  ;;  %s1057_s16 = smov 64  }
  0x4c   :  { %817 = vmatpush3.bf16.msra.mxu1 %v900_v1  ;;  %157 = vrot.lane.b32.xlu0 %v760_v3, %s1056_s15  ;;  %s1058_s17 = smov 32   ;;  %v1167_v8 = vpack.c.bf16 %v253_v7, %v253_v7  ;;  %vm126_vm2 = vcmask 261120   ;;  %v903_v39 = vld [vmem:[#allocation8 + $0x8] ss:$28 sps:$4 sm:$0xff]   ;;  %v904_v40 = vld [vmem:[#allocation8 + $0x40] ss:$28 sps:$4 sm:$0xff]  }
  0x4d   :  { %822 = vmatprep.subr.bf16.mxu1 %v1054_v0  ;;  %247 = vrot.lane.b32.xlu1 %v760_v3, %s1058_s17  ;;  %v905_v41 = vld [vmem:[#allocation8 + $0x78] ss:$28 sps:$4 sm:$0xff]   ;;  %v906_v42 = vld [vmem:[#allocation8 + $0xb0] ss:$28 sps:$4 sm:$0xff]   ;;  %v764_v44 = vld [vmem:[%s1248_s4 + $0x1] ss:$0 sm:$0xff] }
  0x4e   :  { %831 = vmatpush3.bf16.msra.mxu0 %v903_v39  ;;  %v907_v43 = vld [vmem:[#allocation8 + $0xc] ss:$28 sps:$4 sm:$0xff]   ;;  %v908_v45 = vld [vmem:[#allocation8 + $0x44] ss:$28 sps:$4 sm:$0xff]   ;;  %vm300_vm3 = vcmask 523264   ;;  %s1059_s23 = smov 120  }
  0x4f   :  { %819 = vmatmul.mubr.msk.bf16.vlgmr.msra.gmra.mrb[0].mxu1 %vm82_vm1, %v72_v4  ;;  %832 = vmatprep.subr.bf16.mxu0 %v1054_v0  ;;  %vm546_vm4 = vcmask 1043456   ;;  %s1060_s24 = smov 40   ;;  %vm715_vm5 = vcmask 64512   ;;  %s1061_s25 = smov 8   ;;  %vm543_vm6 = vcmask 326656   ;;  %vm721_vm7 = vcmask 130112  }
  0x50   :  { %826 = vmatprep.mubr.msk.bf16.mxu1 %vm1055_vm0, %v1054_v0  ;;  %823 = vmatpush3.bf16.msra.mxu1 %v901_v5  ;;  %vm723_vm8 = vcmask 195712   ;;  %vm725_vm9 = vcmask 261312   ;;  %vm727_vm10 = vcmask 326912   ;;  %vm733_vm11 = vcmask 589120   ;;  %s1062_s0 = smov 72   ;;  %s1063_s21 = smov [#allocation10]  }
  0x51   :  { %824 = vmatprep.subr.bf16.mxu1 %v1054_v0  ;;  %243 = vrot.lane.b32.xlu0 %v760_v3, %s1057_s16  ;;  %s747_s28 = sshll.u32 %s1063_s21, 4  ;;  %vm739_vm12 = vcmask 851520   ;;  %s748_s28 = int_to_ptr.vmem [resolvable:$true] %s747_s28 }
  0x52   :  { %256 = vrot.lane.b32.xlu1 %v1167_v8, %s1058_s17  ;;  %833 = vmatpush3.bf16.msra.mxu0 %v904_v40  ;;  %s1018_s29 = scalar_lea.vmem %s748_s28, 128  ;;  %p1023_p5 = scmp.lt.s32.totalorder %s748_s28, %s748_s28 }
  0x53   :  { %834 = vmatprep.subr.bf16.mxu0 %v1054_v0  ;;  %p1019_p4 = scmp.ne.s32.totalorder %s748_s28, %s1018_s29  ;;  %p1024_p6 = scmp.lt.s32.totalorder %s1018_s29, %s1018_s29 }
  0x54   :  { %825 = vmatpush3.bf16.msra.mxu1 %v902_v6 }
  0x55   :  { %842 = vmatprep.subr.bf16.mxu1 %v1054_v0  ;;  %377 = vrot.lane.b32.xlu0 %v764_v44, %s1057_s16  ;;  %p1025_p7 = por %p1024_p6, %p1023_p5 }
  0x56   :  { %835 = vmatpush3.bf16.msra.mxu0 %v905_v41 }
  0x57   :  { %836 = vmatprep.subr.bf16.mxu0 %v1054_v0  ;;  %p1026_p8 = pnand %p1025_p7, %p1019_p4 }
  0x5a   :  { %837 = vmatpush3.bf16.msra.mxu0 %v906_v42 }
  0x5b   :  { %854 = vmatprep.subr.bf16.mxu0 %v1054_v0 }
  0xbe   :  { %v158_v34 = vpop.permute.xlu0 %157 }
  0xc3   :  { %v244_v7 = vpop.permute.xlu0 %243 }
 0x122   :  { %v120_v9 = vpop.f32.mrb[0].mxu1 }
 0x123   :  { %v127_v10 = vsel %vm126_vm2, %v120_v9, 0.0  ;;  %v820_v11 = vpop.f32.mrb[1].mxu1 }
 0x124   :  { %v128_v12 = vrot.slane %v127_v10, 4  ;;  %v123_v13 = vpop.f32.mrb[2].mxu1 }
 0x125   :  { %v821_v14 = vpop.f32.mrb[3].mxu1 }
 0x126   :  { %v129_v15 = vadd.f32 %v128_v12, %v127_v10  ;;  %v248_v10 = vpop.permute.xlu1 %247 }
 0x128   :  { %v130_v16 = vrot.slane %v129_v15, 2 }
 0x12a   :  { %v131_v17 = vadd.f32 %v130_v16, %v129_v15  ;;  %v257_v14 = vpop.permute.xlu1 %256 }
 0x12c   :  { %v132_v18 = vrot.slane %v131_v17, 1 }
 0x12e   :  { %v133_v19 = vadd.f32 %v132_v18, %v131_v17  ;;  %v909_v17 = vld [vmem:[#allocation8 + $0x7c] ss:$28 sps:$4 sm:$0xff]   ;;  %v910_v18 = vld [vmem:[#allocation8 + $0xb4] ss:$28 sps:$4 sm:$0xff]  }
 0x130   :  { %v135_v20 = vmul.f32 0.125, %v133_v19  ;;  %v911_v19 = vld [vmem:[#allocation8 + $0x10] ss:$28 sps:$4 sm:$0xff]  }
 0x132   :  { %v136_v21 = vsub.f32 %v120_v9, %v135_v20  ;;  %v912_v20 = vld [vmem:[#allocation8 + $0x48] ss:$28 sps:$4 sm:$0xff]  }
 0x134   :  { %v137_v22 = vmul.f32 %v136_v21, %v136_v21 }
 0x136   :  { %v138_v23 = vsel %vm126_vm2, %v137_v22, 0.0 }
 0x137   :  { %v139_v24 = vrot.slane %v138_v23, 4 }
 0x139   :  { %v140_v25 = vadd.f32 %v139_v24, %v138_v23 }
 0x13b   :  { %v141_v26 = vrot.slane %v140_v25, 2 }
 0x13d   :  { %v142_v27 = vadd.f32 %v141_v26, %v140_v25 }
 0x13f   :  { %v143_v28 = vrot.slane %v142_v27, 1 }
 0x141   :  { %v144_v29 = vadd.f32 %v143_v28, %v142_v27  ;;  %v913_v28 = vld [vmem:[#allocation8 + $0x80] ss:$28 sps:$4 sm:$0xff]  }
 0x143   :  { %v145_v30 = vmul.f32 0.125, %v144_v29  ;;  %v914_v29 = vld [vmem:[#allocation8 + $0xb8] ss:$28 sps:$4 sm:$0xff]  }
 0x145   :  { %v146_v31 = vadd.f32 1e-05, %v145_v30  ;;  %v378_v30 = vpop.permute.xlu0 %377 }
 0x147   :  { %920 = vrsqrt.f32 %v146_v31 }
 0x151   :  { %v921_v32 = vpop.eup %920 }
 0x152   :  { %v148_v33 = vmul.f32 %v921_v32, %v136_v21 }
 0x154   :  { %v156_v35 = vmul.f32 %v760_v3, %v148_v33 }
 0x156   :  { %v160_v36 = vadd.f32 %v158_v34, %v156_v35 }
 0x158   :  { %v161_v37 = vmax.f32 %v160_v36, 0.0 }
 0x15a   :  { %v162_v38 = vpack.c.bf16 %v161_v37, %v161_v37 }
 0x15c   :  { %827 = vmatmul.mubr.msk.bf16.vlgmr.msra.gmra.mrb[4].mxu1 %vm126_vm2, %v162_v38  ;;  %v775_v38 = vld [vmem:[%s1248_s4 + $0x2] ss:$0 sm:$0xff] }
 0x15d   :  { %850 = vmatprep.mubr.msk.bf16.mxu1 %vm1055_vm0, %v1054_v0  ;;  %843 = vmatpush3.bf16.msra.mxu1 %v907_v43 }
 0x15e   :  { %844 = vmatprep.subr.bf16.mxu1 %v1054_v0 }
 0x161   :  { %845 = vmatpush3.bf16.msra.mxu1 %v908_v45 }
 0x162   :  { %846 = vmatprep.subr.bf16.mxu1 %v1054_v0 }
 0x165   :  { %847 = vmatpush3.bf16.msra.mxu1 %v909_v17 }
 0x166   :  { %848 = vmatprep.subr.bf16.mxu1 %v1054_v0 }
 0x169   :  { %849 = vmatpush3.bf16.msra.mxu1 %v910_v18 }
 0x16a   :  { %866 = vmatprep.subr.bf16.mxu1 %v1054_v0 }
 0x22f   :  { %v216_v46 = vpop.f32.mrb[4].mxu1 }
 0x230   :  { %v222_v47 = vsel %vm126_vm2, %v216_v46, 0.0  ;;  %v828_v48 = vpop.f32.mrb[5].mxu1 }
 0x231   :  { %v223_v49 = vrot.slane %v222_v47, 4  ;;  %v219_v50 = vpop.f32.mrb[6].mxu1  ;;  %v916_v48 = vld [vmem:[#allocation8 + $0x4c] ss:$28 sps:$4 sm:$0xff]  }
 0x232   :  { %v829_v51 = vpop.f32.mrb[7].mxu1 }
 0x233   :  { %v224_v52 = vadd.f32 %v223_v49, %v222_v47  ;;  %v915_v47 = vld [vmem:[#allocation8 + $0x14] ss:$28 sps:$4 sm:$0xff]   ;;  %v917_v49 = vld [vmem:[#allocation8 + $0x84] ss:$0 sps:$4 sm:$0xff]   ;;  %v73_v51 = vld [vmem:[#allocation7] sm:$0xff] }
 0x234   :  { %v548_v50 = vsel %vm546_vm4, %v917_v49, 0 }
 0x235   :  { %v225_v53 = vrot.slane %v224_v52, 2 }
 0x237   :  { %v226_v54 = vadd.f32 %v225_v53, %v224_v52 }
 0x239   :  { %v227_v55 = vrot.slane %v226_v54, 1 }
 0x23b   :  { %v228_v56 = vadd.f32 %v227_v55, %v226_v54 }
 0x23d   :  { %v229_v57 = vmul.f32 0.125, %v228_v56 }
 0x23f   :  { %v230_v58 = vsub.f32 %v216_v46, %v229_v57 }
 0x241   :  { %v231_v59 = vmul.f32 %v230_v58, %v230_v58 }
 0x243   :  { %v232_v60 = vsel %vm126_vm2, %v231_v59, 0.0 }
 0x244   :  { %v233_v61 = vrot.slane %v232_v60, 4 }
 0x246   :  { %v234_v62 = vadd.f32 %v233_v61, %v232_v60 }
 0x248   :  { %v235_v63 = vrot.slane %v234_v62, 2 }
 0x24a   :  { %v236_v1 = vadd.f32 %v235_v63, %v234_v62  ;;  %v918_v63 = vld [vmem:[#allocation8 + $0x18] ss:$28 sps:$4 sm:$0xff]  }
 0x24c   :  { %v237_v2 = vrot.slane %v236_v1, 1 }
 0x24e   :  { %v238_v3 = vadd.f32 %v237_v2, %v236_v1 }
 0x250   :  { %v239_v4 = vmul.f32 0.125, %v238_v3 }
 0x252   :  { %v240_v5 = vadd.f32 1e-05, %v239_v4 }
 0x254   :  { %922 = vrsqrt.f32 %v240_v5 }
 0x25e   :  { %v923_v6 = vpop.eup %922 }
 0x25f   :  { %v242_v9 = vmul.f32 %v923_v6, %v230_v58 }
 0x261   :  { %v246_v11 = vmul.f32 %v244_v7, %v242_v9 }
 0x263   :  { %v250_v12 = vadd.f32 %v248_v10, %v246_v11 }
 0x265   :  { %v1188_v13 = vmax.f32 %v250_v12, 0.0 }
 0x267   :  { %v252_v15 = vpack.c.bf16 %v1188_v13, %v1188_v13 }
 0x269   :  { %v260_v16 = vsel %vm126_vm2, %v252_v15, %v257_v14 }
 0x26a   :  { %839 = vmatmul.mubr.msk.bf16.vlgmr.msra.gmra.mrb[0].mxu0 %vm300_vm3, %v260_v16 }
 0x26b   :  { %862 = vmatprep.mubr.msk.bf16.mxu0 %vm1055_vm0, %v1054_v0  ;;  %855 = vmatpush3.bf16.msra.mxu0 %v911_v19 }
 0x26c   :  { %856 = vmatprep.subr.bf16.mxu0 %v1054_v0 }
 0x26f   :  { %857 = vmatpush3.bf16.msra.mxu0 %v912_v20 }
 0x270   :  { %858 = vmatprep.subr.bf16.mxu0 %v1054_v0 }
 0x273   :  { %859 = vmatpush3.bf16.msra.mxu0 %v913_v28 }
 0x274   :  { %860 = vmatprep.subr.bf16.mxu0 %v1054_v0 }
 0x277   :  { %861 = vmatpush3.bf16.msra.mxu0 %v914_v29 }
 0x278   :  { %876 = vmatprep.subr.bf16.mxu0 %v1054_v0 }
 0x33d   :  { %v337_v21 = vpop.f32.mrb[0].mxu0 }
 0x33e   :  { %v338_v22 = vadd.f32 %v764_v44, %v337_v21  ;;  %v840_v23 = vpop.f32.mrb[1].mxu0 }
 0x33f   :  { %v340_v24 = vpop.f32.mrb[2].mxu0 }
 0x340   :  { %v343_v25 = vmax.f32 %v338_v22, 0.0  ;;  %v841_v26 = vpop.f32.mrb[3].mxu0 }
 0x342   :  { %v344_v27 = vpack.c.bf16 %v343_v25, %v343_v25 }
 0x344   :  { %851 = vmatmul.mubr.msk.bf16.vlgmr.msra.gmra.mrb[8].mxu1 %vm300_vm3, %v344_v27 }
 0x345   :  { %872 = vmatprep.mubr.msk.bf16.mxu1 %vm1055_vm0, %v1054_v0  ;;  %867 = vmatpush3.bf16.msra.mxu1 %v915_v47 }
 0x346   :  { %868 = vmatprep.subr.bf16.mxu1 %v1054_v0 }
 0x349   :  { %869 = vmatpush3.bf16.msra.mxu1 %v916_v48 }
 0x34a   :  { %870 = vmatprep.subr.bf16.mxu1 %v1054_v0 }
 0x34d   :  { %871 = vmatpush3.bf16.msra.mxu1 %v548_v50 }
 0x417   :  { %v417_v31 = vpop.f32.mrb[8].mxu1 }
 0x418   :  { %v418_v32 = vadd.f32 %v417_v31, %v378_v30  ;;  %v852_v33 = vpop.f32.mrb[9].mxu1 }
 0x419   :  { %v420_v34 = vpop.f32.mrb[10].mxu1 }
 0x41a   :  { %v423_v35 = vmax.f32 %v418_v32, 0.0  ;;  %v853_v36 = vpop.f32.mrb[11].mxu1 }
 0x41c   :  { %v424_v37 = vpack.c.bf16 %v423_v35, %v423_v35 }
 0x41e   :  { %863 = vmatmul.mubr.msk.bf16.vlgmr.msra.gmra.mrb[4].mxu0 %vm300_vm3, %v424_v37 }
 0x41f   :  { %880 = vmatprep.mubr.msk.bf16.mxu0 %vm1055_vm0, %v1054_v0  ;;  %877 = vmatpush3.bf16.msra.mxu0 %v918_v63 }
 0x420   :  { %878 = vmatprep.subr.bf16.mxu0 %v1054_v0 }
 0x4f1   :  { %v501_v39 = vpop.f32.mrb[4].mxu0 }
 0x4f2   :  { %v502_v40 = vadd.f32 %v775_v38, %v501_v39  ;;  %v864_v41 = vpop.f32.mrb[5].mxu0 }
 0x4f3   :  { %v504_v42 = vpop.f32.mrb[6].mxu0 }
 0x4f4   :  { %v507_v43 = vmul.f32 0.5, %v502_v40  ;;  %v865_v44 = vpop.f32.mrb[7].mxu0 }
 0x4f6   :  { %v508_v45 = vmul.f32 1.442695, %v507_v43 }
 0x4f8   :  { %924 = vpow2.f32 %v508_v45 }
 0x502   :  { %v925_v46 = vpop.eup %924 }
 0x503   :  { %511 = vrot.lane.b32.xlu1 %v925_v46, %s1059_s23 }
 0x507   :  { %611 = vrot.lane.b32.xlu1 %v775_v38, %s1056_s15 }
 0x50b   :  { %701 = vrot.lane.b32.xlu1 %v775_v38, %s1058_s17 }
 0x50f   :  { %730 = vrot.lane.b32.xlu1 %v1188_v13, %s1060_s24 }
 0x575   :  { %v512_v52 = vpop.permute.xlu1 %511 }
 0x576   :  { %v514_v53 = vmul.f32 %v512_v52, %v73_v51 }
 0x578   :  { %v515_v54 = vadd.f32 %v514_v53, %v502_v40 }
 0x579   :  { %v612_v56 = vpop.permute.xlu1 %611 }
 0x57a   :  { %v516_v55 = vpack.c.bf16 %v515_v54, %v515_v54  ;;  %716 = vst.msk [vmem:[#allocation10] sm:$0xff] %vm715_vm5, %v515_v54 }
 0x57c   :  { %518 = vrot.lane.b32.xlu0 %v516_v55, %s1058_s17  ;;  %v788_v55 = vld [vmem:[%s1248_s4 + $0x3] ss:$0 sm:$0xff] }
 0x57d   :  { %v1220_v60 = vpop.permute.xlu1 %701 }
 0x580   :  { %615 = vrot.lane.b32.xlu0 %v775_v38, %s1057_s16 }
 0x581   :  { %v731_v62 = vpop.permute.xlu1 %730 }
 0x584   :  { %718 = vrot.lane.b32.xlu0 %v502_v40, %s1061_s25 }
 0x5ee   :  { %v519_v57 = vpop.permute.xlu0 %518 }
 0x5ef   :  { %v522_v58 = vsel %vm126_vm2, %v1167_v8, %v519_v57  ;;  %v919_v8 = vld [vmem:[#allocation8 + $0x50] ss:$28 sps:$4 sm:$0xff]  }
 0x5f0   :  { %873 = vmatmul.mubr.msk.bf16.vlgmr.msra.gmra.mrb[12].mxu1 %vm543_vm6, %v522_v58  ;;  %879 = vmatpush3.bf16.msra.mxu0 %v919_v8 }
 0x5f2   :  { %v616_v59 = vpop.permute.xlu0 %615 }
 0x5f6   :  { %v719_v61 = vpop.permute.xlu0 %718 }
 0x5f7   :  { %722 = vst.msk [vmem:[#allocation10] sm:$0xff] %vm721_vm7, %v719_v61 }
 0x5f8   :  { %724 = vst.msk [vmem:[#allocation10] sm:$0xff] %vm723_vm8, %v719_v61 }
 0x5f9   :  { %726 = vst.msk [vmem:[#allocation10] sm:$0xff] %vm725_vm9, %v719_v61 }
 0x5fa   :  { %728 = vst.msk [vmem:[#allocation10] sm:$0xff] %vm727_vm10, %v719_v61 }
 0x5fb   :  { %734 = vst.msk [vmem:[#allocation10] sm:$0xff] %vm733_vm11, %v731_v62 }
 0x6c3   :  { %v584_v1 = vpop.f32.mrb[12].mxu1 }
 0x6c4   :  { %v590_v2 = vsel %vm126_vm2, %v584_v1, 0.0  ;;  %v874_v3 = vpop.f32.mrb[13].mxu1 }
 0x6c5   :  { %v591_v4 = vrot.slane %v590_v2, 4  ;;  %v587_v5 = vpop.f32.mrb[14].mxu1 }
 0x6c6   :  { %v875_v6 = vpop.f32.mrb[15].mxu1 }
 0x6c7   :  { %v592_v7 = vadd.f32 %v591_v4, %v590_v2 }
 0x6c9   :  { %v593_v9 = vrot.slane %v592_v7, 2 }
 0x6cb   :  { %v594_v10 = vadd.f32 %v593_v9, %v592_v7 }
 0x6cd   :  { %v595_v11 = vrot.slane %v594_v10, 1 }
 0x6cf   :  { %v596_v12 = vadd.f32 %v595_v11, %v594_v10 }
 0x6d1   :  { %v597_v13 = vmul.f32 0.125, %v596_v12 }
 0x6d3   :  { %v598_v14 = vsub.f32 %v584_v1, %v597_v13 }
 0x6d5   :  { %v599_v15 = vmul.f32 %v598_v14, %v598_v14 }
 0x6d7   :  { %v600_v16 = vsel %vm126_vm2, %v599_v15, 0.0 }
 0x6d8   :  { %v601_v0 = vrot.slane %v600_v16, 4 }
 0x6da   :  { %v602_v17 = vadd.f32 %v601_v0, %v600_v16 }
 0x6dc   :  { %v603_v18 = vrot.slane %v602_v17, 2 }
 0x6de   :  { %v604_v19 = vadd.f32 %v603_v18, %v602_v17 }
 0x6e0   :  { %v605_v20 = vrot.slane %v604_v19, 1 }
 0x6e2   :  { %v606_v21 = vadd.f32 %v605_v20, %v604_v19 }
 0x6e4   :  { %v607_v22 = vmul.f32 0.125, %v606_v21 }
 0x6e6   :  { %v608_v23 = vadd.f32 1e-05, %v607_v22 }
 0x6e8   :  { %926 = vrsqrt.f32 %v608_v23 }
 0x6f2   :  { %v927_v24 = vpop.eup %926 }
 0x6f3   :  { %v610_v25 = vmul.f32 %v927_v24, %v598_v14 }
 0x6f5   :  { %v614_v26 = vmul.f32 %v612_v56, %v610_v25 }
 0x6f7   :  { %v618_v27 = vadd.f32 %v616_v59, %v614_v26 }
 0x6f9   :  { %v619_v28 = vmax.f32 %v618_v27, 0.0 }
 0x6fb   :  { %v620_v29 = vpack.c.bf16 %v619_v28, %v619_v28 }
 0x6fd   :  { %881 = vmatmul.mubr.msk.bf16.vlgmr.msra.gmra.mrb[8].mxu0 %vm126_vm2, %v620_v29 }
 0x7d0   :  { %v674_v30 = vpop.f32.mrb[8].mxu0 }
 0x7d1   :  { %v680_v31 = vsel %vm126_vm2, %v674_v30, 0.0  ;;  %v882_v32 = vpop.f32.mrb[9].mxu0 }
 0x7d2   :  { %v681_v33 = vrot.slane %v680_v31, 4  ;;  %v677_v34 = vpop.f32.mrb[10].mxu0 }
 0x7d3   :  { %v883_v35 = vpop.f32.mrb[11].mxu0 }
 0x7d4   :  { %v682_v36 = vadd.f32 %v681_v33, %v680_v31 }
 0x7d6   :  { %v683_v37 = vrot.slane %v682_v36, 2 }
 0x7d8   :  { %v684_v38 = vadd.f32 %v683_v37, %v682_v36 }
 0x7da   :  { %v685_v39 = vrot.slane %v684_v38, 1 }
 0x7dc   :  { %v686_v40 = vadd.f32 %v685_v39, %v684_v38 }
 0x7de   :  { %v687_v41 = vmul.f32 0.125, %v686_v40 }
 0x7e0   :  { %v688_v42 = vsub.f32 %v674_v30, %v687_v41 }
 0x7e2   :  { %v689_v43 = vmul.f32 %v688_v42, %v688_v42 }
 0x7e4   :  { %v690_v44 = vsel %vm126_vm2, %v689_v43, 0.0 }
 0x7e5   :  { %v691_v45 = vrot.slane %v690_v44, 4 }
 0x7e7   :  { %v692_v46 = vadd.f32 %v691_v45, %v690_v44 }
 0x7e9   :  { %v693_v47 = vrot.slane %v692_v46, 2 }
 0x7eb   :  { %v694_v48 = vadd.f32 %v693_v47, %v692_v46 }
 0x7ed   :  { %v695_v49 = vrot.slane %v694_v48, 1 }
 0x7ef   :  { %v696_v50 = vadd.f32 %v695_v49, %v694_v48 }
 0x7f1   :  { %v697_v51 = vmul.f32 0.125, %v696_v50 }
 0x7f3   :  { %v698_v52 = vadd.f32 1e-05, %v697_v51 }
 0x7f5   :  { %928 = vrsqrt.f32 %v698_v52 }
 0x7ff   :  { %v929_v53 = vpop.eup %928 }
 0x800   :  { %v700_v54 = vmul.f32 %v929_v53, %v688_v42 }
 0x802   :  { %v704_v56 = vmul.f32 %v1220_v60, %v700_v54 }
 0x804   :  { %v712_v57 = vadd.f32 %v788_v55, %v704_v56 }
 0x806   :  { %v713_v58 = vmax.f32 %v712_v57, 0.0 }
 0x808   :  { %736 = vrot.lane.b32.xlu0 %v713_v58, %s1062_s0 }
 0x87a   :  { %v737_v59 = vpop.permute.xlu0 %736 }
 0x87b   :  { %740 = vst.msk [vmem:[#allocation10] sm:$0xff] %vm739_vm12, %v737_v59 }
 0x87c   :  { %1029 = shalt.err (!%p1026_p8)
}
 0x87d   :  { %s1030_s6 = scalar_lea.hbm %s1249_s5, 128 }
 0x87e   :  { %p1031_p9 = scmp.ne.s32.totalorder %s1249_s5, %s1030_s6  ;;  %p1034_p10 = scmp.lt.u32.totalorder %s1030_s6, %s1249_s5 }
 0x880   :  { %p1036_p11 = pnand %p1034_p10, %p1031_p9 }
 0x882   :  { %1039 = shalt.err (!%p1036_p11)
}
 0x883   :  { %750 = dma.vmem_to_hbm [thread:$0]  %s748_s28, 128, %s1249_s5, [#allocation4]  }
 0x884   :  { %1046 = dma.done.wait [#allocation4], 128  }
 0x885   :  { %1047 = vsyncadd [#allocation4], 4294967168 }
 0x886   :  { %754 = vsyncpa [#allocation3], 1 }
 0x887   :  { %755 = vsyncpa [#allocation6], 1 }
 0x888   :  { %756 = vsyncpa [#allocation9], 1 }
 0x889   :  { %757 = vsyncpa [#allocation4], 1 }

</bundles_post_ra>
